<compile_context>
chip_gen: v6e
topology: v6e:2x2x1
jax: 0.10.0
libtpu: 0.0.40
codegen_flags: <defaults>
</compile_context>

<pallas_src>
import functools

import jax
import jax.numpy as jnp
from jax.experimental import pallas as pl
from jax.experimental.pallas import tpu as pltpu

_LANE = 128      # lane width (last-dim alignment)
_SUBLANE = 8     # f32/bf16-block sublane alignment for the batch axis


def _round_up(n, m):
    return ((n + m - 1) // m) * m


def _fused_mlp_kernel(*refs, n_layers):
    """Whole MLP for one batch tile; activations never leave the core.

    refs = (x_ref, w0, b0, w1, b1, ..., o_ref)
      x_ref : [tm, Din_p]        bf16  (lane-padded, zero padding)
      wL    : [DinL_p, DoutL_p]  bf16  (lane-dense, VMEM-resident)
      bL    : [1, DoutL_p]       f32
      o_ref : [tm, Dout_p]       f32
    """
    x_ref = refs[0]
    o_ref = refs[-1]
    wb = refs[1:-1]

    h = x_ref[...]                                 # bf16, no extra cast
    for layer in range(n_layers):
        w = wb[2 * layer][...]                     # bf16 weight block
        b = wb[2 * layer + 1][...]                 # f32 bias (1, Dout_p)
        # bf16 operands -> MXU, f32 accumulation.
        y = jnp.dot(h, w, preferred_element_type=jnp.float32) + b
        if layer != n_layers - 1:
            # Carry activations in bf16: halves live vreg/VMEM pressure.
            h = jnp.maximum(y, 0.0).astype(jnp.bfloat16)
        else:
            h = y                                  # final layer stays f32
    o_ref[...] = h.astype(o_ref.dtype)


def prepare_multilayer_net_params(params):
    """One-time packing: pad feature dims to 128 lanes, weights -> bf16.

    Hoisted out of the forward so repeated calls never re-pay the
    zeros + dynamic-update-slice per weight in HBM.
    params: list of (w, b), w: [Din, Dout] (y = x @ W + b), b: [Dout].
    """
    dims = [params[0][0].shape[0]] + [w.shape[1] for (w, _) in params]
    dims_p = [_round_up(d, _LANE) for d in dims]
    packed = []
    for idx, (w, b) in enumerate(params):
        din, dout = w.shape
        w_p = jnp.zeros((dims_p[idx], dims_p[idx + 1]), jnp.bfloat16)
        w_p = w_p.at[:din, :dout].set(w.astype(jnp.bfloat16))
        b_p = jnp.zeros((1, dims_p[idx + 1]), jnp.float32)
        b_p = b_p.at[:, :dout].set(b.astype(jnp.float32))
        packed.append((w_p, b_p))
    return {"packed": packed, "dims": tuple(dims), "dims_p": tuple(dims_p)}


def multilayer_net_forward(prepared, x, *, batch_tile=512, min_batch_tiles=2):
    """Fused MultilayerNet forward: one pallas_call for the whole network."""
    packed = prepared["packed"]
    dims = prepared["dims"]
    dims_p = prepared["dims_p"]
    n_layers = len(packed)
    num_in, num_out = dims[0], dims[-1]
    din_p, dout_p = dims_p[0], dims_p[-1]

    B = x.shape[0]
    assert x.shape[1] == num_in, (x.shape, num_in)

    # Batch tiling: at least `min_batch_tiles` grid steps so v7x's two
    # TensorCores both get work on the "parallel" axis; tm grows toward
    # batch_tile for large batches (higher HBM efficiency, less per-step
    # overhead). tm is sublane-aligned.
    tm = min(batch_tile,
             max(_SUBLANE, _round_up(pl.cdiv(B, min_batch_tiles), _SUBLANE)))
    n_tiles = max(min_batch_tiles, pl.cdiv(B, tm))
    B_p = n_tiles * tm

    # Per-call work on x only: pad + cast to bf16 once (the cast would happen
    # before the first MXU dot anyway; this halves the per-tile HBM stream).
    x_p = jnp.zeros((B_p, din_p), jnp.bfloat16)
    x_p = x_p.at[:B, :num_in].set(x.astype(jnp.bfloat16))

    flat_params = []
    for (w_p, b_p) in packed:
        flat_params.extend([w_p, b_p])

    # Explicit VMEM budget: single-buffered weights/biases, double-buffered
    # x/out tiles, activation headroom, + slack. Capped at 64 MiB so the
    # request is valid on v7x as well as v5e/v6e.
    weight_bytes = sum(w.size * 2 + b.size * 4 for (w, b) in packed)
    io_bytes = 2 * tm * din_p * 2 + 2 * tm * dout_p * 4
    act_bytes = 4 * tm * max(dims_p) * 4
    vmem_limit = int(min(weight_bytes + io_bytes + act_bytes + (4 << 20),
                         64 << 20))

    flops = sum(2 * B_p * dims_p[i] * dims_p[i + 1] for i in range(n_layers))
    bytes_accessed = x_p.size * 2 + weight_bytes + B_p * dout_p * 4
    cost = pl.CostEstimate(flops=flops, transcendentals=0,
                           bytes_accessed=bytes_accessed)

    kernel = functools.partial(_fused_mlp_kernel, n_layers=n_layers)
    out_shape = jax.ShapeDtypeStruct((B_p, dout_p), jnp.float32)
    out_specs = pl.BlockSpec((tm, dout_p), lambda i: (i, 0))
    grid = (n_tiles,)

    def build(single_buffer_weights):
        in_specs = [pl.BlockSpec((tm, din_p), lambda i: (i, 0))]
        for (w_p, b_p) in packed:
            if single_buffer_weights:
                # Constant block index across the grid -> double-buffering is
                # pure VMEM waste; request a single resident buffer.
                in_specs.append(pl.BlockSpec(w_p.shape, lambda i: (0, 0),
                                             pipeline_mode=pl.Buffered(1)))
                in_specs.append(pl.BlockSpec(b_p.shape, lambda i: (0, 0),
                                             pipeline_mode=pl.Buffered(1)))
            else:
                in_specs.append(pl.BlockSpec(w_p.shape, lambda i: (0, 0)))
                in_specs.append(pl.BlockSpec(b_p.shape, lambda i: (0, 0)))
        return pl.pallas_call(
            kernel,
            out_shape=out_shape,
            grid=grid,
            in_specs=in_specs,
            out_specs=out_specs,
            compiler_params=pltpu.CompilerParams(
                dimension_semantics=("parallel",),
                vmem_limit_bytes=vmem_limit),
            cost_estimate=cost,
        )

    try:
        out_p = build(True)(x_p, *flat_params)
    except Exception:
        # Fallback if this jax build rejects Buffered(1) on a top-level
        # pallas_call BlockSpec: identical kernel, default buffering.
        out_p = build(False)(x_p, *flat_params)

    # Slice away batch + lane padding outside the kernel.
    return out_p[:B, :num_out]


def init_multilayer_net_params(key, num_in_feat, num_hid_layer,
                               num_hid_feat, num_out_feat):
    """PyTorch-style U(-1/sqrt(fan_in), +1/sqrt(fan_in)) init, f32 masters.

    Weights stored as [in_features, out_features] so y = x @ W + b.
    """
    params = []
    dims = [(num_in_feat, num_hid_feat)]
    dims += [(num_hid_feat, num_hid_feat)] * num_hid_layer
    dims += [(num_hid_feat, num_out_feat)]
    for (din, dout) in dims:
        key, kw, kb = jax.random.split(key, 3)
        bound = 1.0 / jnp.sqrt(jnp.float32(din))
        w = jax.random.uniform(kw, (din, dout), jnp.float32, -bound, bound)
        b = jax.random.uniform(kb, (dout,), jnp.float32, -bound, bound)
        params.append((w, b))
    return params


def multilayer_net_reference(params, x):
    """Plain-JAX reference mirroring the kernel's bf16-carry / f32-accum math.

    NOTE: this (and the kernel) deliberately use bf16 MXU operands — a
    precision drop vs the f32 PyTorch module; expect ~1e-2-level rel. error
    for deep/wide nets.
    """
    n_layers = len(params)
    h = x.astype(jnp.bfloat16)
    for idx, (w, b) in enumerate(params):
        y = jnp.dot(h, w.astype(jnp.bfloat16),
                    preferred_element_type=jnp.float32)
        y = y + b.astype(jnp.float32)
        if idx != n_layers - 1:
            h = jnp.maximum(y, 0.0).astype(jnp.bfloat16)
        else:
            h = y
    return h


if __name__ == "__main__":
    # Small shapes consistent with the module's forward (tabular MLP).
    batch = 8
    num_in_feat = 16
    num_hid_layer = 2
    num_hid_feat = 32
    num_out_feat = 4

    key = jax.random.PRNGKey(0)
    key, kx = jax.random.split(key)
    x = jax.random.normal(kx, (batch, num_in_feat), jnp.float32)

    params = init_multilayer_net_params(
        key, num_in_feat, num_hid_layer, num_hid_feat, num_out_feat
    )
    prepared = prepare_multilayer_net_params(params)   # one-time packing

    out = multilayer_net_forward(prepared, x)
    out = jax.block_until_ready(out)

    ref = multilayer_net_reference(params, x)
    assert out.shape == (batch, num_out_feat), out.shape
    assert jnp.allclose(out, ref, atol=1e-2, rtol=1e-2), "mismatch vs reference"

    print("KERNEL_OK")
</pallas_src>

<mosaic_0001>
module attributes {stable_mosaic.version = 11 : i64} {
  func.func @_fused_mlp_kernel(%arg0: i32, %arg1: memref<8x128xbf16, #tpu.memory_space<vmem>>, %arg2: memref<128x128xbf16, #tpu.memory_space<vmem>>, %arg3: memref<1x128xf32, #tpu.memory_space<vmem>>, %arg4: memref<128x128xbf16, #tpu.memory_space<vmem>>, %arg5: memref<1x128xf32, #tpu.memory_space<vmem>>, %arg6: memref<128x128xbf16, #tpu.memory_space<vmem>>, %arg7: memref<1x128xf32, #tpu.memory_space<vmem>>, %arg8: memref<128x128xbf16, #tpu.memory_space<vmem>>, %arg9: memref<1x128xf32, #tpu.memory_space<vmem>>, %arg10: memref<8x128xf32, #tpu.memory_space<vmem>>) attributes {dimension_semantics = [#tpu.dimension_semantics<parallel>], iteration_bounds = array<i64: 2>, scalar_prefetch = 0 : i64, scratch_operands = 0 : i64, tpu.core_type = #tpu.core_type<tc>, window_params = [{transform_indices = @transform_0, window_bounds = array<i64: 8, 128>}, {pipeline_mode = #tpu.pipeline_mode<synchronous>, transform_indices = @transform_1, window_bounds = array<i64: 128, 128>}, {pipeline_mode = #tpu.pipeline_mode<synchronous>, transform_indices = @transform_2, window_bounds = array<i64: 1, 128>}, {pipeline_mode = #tpu.pipeline_mode<synchronous>, transform_indices = @transform_3, window_bounds = array<i64: 128, 128>}, {pipeline_mode = #tpu.pipeline_mode<synchronous>, transform_indices = @transform_4, window_bounds = array<i64: 1, 128>}, {pipeline_mode = #tpu.pipeline_mode<synchronous>, transform_indices = @transform_5, window_bounds = array<i64: 128, 128>}, {pipeline_mode = #tpu.pipeline_mode<synchronous>, transform_indices = @transform_6, window_bounds = array<i64: 1, 128>}, {pipeline_mode = #tpu.pipeline_mode<synchronous>, transform_indices = @transform_7, window_bounds = array<i64: 128, 128>}, {pipeline_mode = #tpu.pipeline_mode<synchronous>, transform_indices = @transform_8, window_bounds = array<i64: 1, 128>}, {transform_indices = @transform_9, window_bounds = array<i64: 8, 128>}]} {
    %c0 = arith.constant 0 : index
    %c0_0 = arith.constant 0 : index
    %0 = vector.load %arg1[%c0, %c0_0] : memref<8x128xbf16, #tpu.memory_space<vmem>>, vector<8x128xbf16>
    %c0_1 = arith.constant 0 : index
    %c0_2 = arith.constant 0 : index
    %1 = vector.load %arg2[%c0_1, %c0_2] : memref<128x128xbf16, #tpu.memory_space<vmem>>, vector<128x128xbf16>
    %c0_3 = arith.constant 0 : index
    %c0_4 = arith.constant 0 : index
    %2 = vector.load %arg3[%c0_3, %c0_4] : memref<1x128xf32, #tpu.memory_space<vmem>>, vector<1x128xf32>
    %cst = arith.constant dense<0.000000e+00> : vector<8x128xf32>
    %3 = tpu.matmul %0, %1, %cst {dimension_numbers = #tpu.dot_dimension_numbers<[1], [0], [0], [1], [0, 0, 1, 1], [], []>} : vector<8x128xbf16>, vector<128x128xbf16>, vector<8x128xf32> -> vector<8x128xf32>
    %4 = vector.broadcast %2 : vector<1x128xf32> to vector<8x128xf32>
    %5 = arith.addf %3, %4 : vector<8x128xf32>
    %cst_5 = arith.constant 0.000000e+00 : f32
    %6 = vector.broadcast %cst_5 : f32 to vector<8x128xf32>
    %7 = arith.maximumf %5, %6 : vector<8x128xf32>
    %8 = arith.truncf %7 : vector<8x128xf32> to vector<8x128xbf16>
    %c0_6 = arith.constant 0 : index
    %c0_7 = arith.constant 0 : index
    %9 = vector.load %arg4[%c0_6, %c0_7] : memref<128x128xbf16, #tpu.memory_space<vmem>>, vector<128x128xbf16>
    %c0_8 = arith.constant 0 : index
    %c0_9 = arith.constant 0 : index
    %10 = vector.load %arg5[%c0_8, %c0_9] : memref<1x128xf32, #tpu.memory_space<vmem>>, vector<1x128xf32>
    %cst_10 = arith.constant dense<0.000000e+00> : vector<8x128xf32>
    %11 = tpu.matmul %8, %9, %cst_10 {dimension_numbers = #tpu.dot_dimension_numbers<[1], [0], [0], [1], [0, 0, 1, 1], [], []>} : vector<8x128xbf16>, vector<128x128xbf16>, vector<8x128xf32> -> vector<8x128xf32>
    %12 = vector.broadcast %10 : vector<1x128xf32> to vector<8x128xf32>
    %13 = arith.addf %11, %12 : vector<8x128xf32>
    %cst_11 = arith.constant 0.000000e+00 : f32
    %14 = vector.broadcast %cst_11 : f32 to vector<8x128xf32>
    %15 = arith.maximumf %13, %14 : vector<8x128xf32>
    %16 = arith.truncf %15 : vector<8x128xf32> to vector<8x128xbf16>
    %c0_12 = arith.constant 0 : index
    %c0_13 = arith.constant 0 : index
    %17 = vector.load %arg6[%c0_12, %c0_13] : memref<128x128xbf16, #tpu.memory_space<vmem>>, vector<128x128xbf16>
    %c0_14 = arith.constant 0 : index
    %c0_15 = arith.constant 0 : index
    %18 = vector.load %arg7[%c0_14, %c0_15] : memref<1x128xf32, #tpu.memory_space<vmem>>, vector<1x128xf32>
    %cst_16 = arith.constant dense<0.000000e+00> : vector<8x128xf32>
    %19 = tpu.matmul %16, %17, %cst_16 {dimension_numbers = #tpu.dot_dimension_numbers<[1], [0], [0], [1], [0, 0, 1, 1], [], []>} : vector<8x128xbf16>, vector<128x128xbf16>, vector<8x128xf32> -> vector<8x128xf32>
    %20 = vector.broadcast %18 : vector<1x128xf32> to vector<8x128xf32>
    %21 = arith.addf %19, %20 : vector<8x128xf32>
    %cst_17 = arith.constant 0.000000e+00 : f32
    %22 = vector.broadcast %cst_17 : f32 to vector<8x128xf32>
    %23 = arith.maximumf %21, %22 : vector<8x128xf32>
    %24 = arith.truncf %23 : vector<8x128xf32> to vector<8x128xbf16>
    %c0_18 = arith.constant 0 : index
    %c0_19 = arith.constant 0 : index
    %25 = vector.load %arg8[%c0_18, %c0_19] : memref<128x128xbf16, #tpu.memory_space<vmem>>, vector<128x128xbf16>
    %c0_20 = arith.constant 0 : index
    %c0_21 = arith.constant 0 : index
    %26 = vector.load %arg9[%c0_20, %c0_21] : memref<1x128xf32, #tpu.memory_space<vmem>>, vector<1x128xf32>
    %cst_22 = arith.constant dense<0.000000e+00> : vector<8x128xf32>
    %27 = tpu.matmul %24, %25, %cst_22 {dimension_numbers = #tpu.dot_dimension_numbers<[1], [0], [0], [1], [0, 0, 1, 1], [], []>} : vector<8x128xbf16>, vector<128x128xbf16>, vector<8x128xf32> -> vector<8x128xf32>
    %28 = vector.broadcast %26 : vector<1x128xf32> to vector<8x128xf32>
    %29 = arith.addf %27, %28 : vector<8x128xf32>
    %c0_23 = arith.constant 0 : index
    %c0_24 = arith.constant 0 : index
    %30 = vector.load %arg10[%c0_23, %c0_24] : memref<8x128xf32, #tpu.memory_space<vmem>>, vector<8x128xf32>
    tpu.vector_store %arg10[%c0_23, %c0_24], %29 {strides = array<i32>} : memref<8x128xf32, #tpu.memory_space<vmem>>, vector<8x128xf32>,
    return
  }
  func.func @transform_0(%arg0: i32) -> (i32, i32) {
    %c0_i32 = arith.constant 0 : i32
    %c0_i32_0 = arith.constant 0 : i32
    return %arg0, %c0_i32 : i32, i32
  }
  func.func @transform_1(%arg0: i32) -> (i32, i32) {
    %c0_i32 = arith.constant 0 : i32
    %c0_i32_0 = arith.constant 0 : i32
    %c0_i32_1 = arith.constant 0 : i32
    return %c0_i32, %c0_i32_0 : i32, i32
  }
  func.func @transform_2(%arg0: i32) -> (i32, i32) {
    %c0_i32 = arith.constant 0 : i32
    %c0_i32_0 = arith.constant 0 : i32
    %c0_i32_1 = arith.constant 0 : i32
    return %c0_i32, %c0_i32_0 : i32, i32
  }
  func.func @transform_3(%arg0: i32) -> (i32, i32) {
    %c0_i32 = arith.constant 0 : i32
    %c0_i32_0 = arith.constant 0 : i32
    %c0_i32_1 = arith.constant 0 : i32
    return %c0_i32, %c0_i32_0 : i32, i32
  }
  func.func @transform_4(%arg0: i32) -> (i32, i32) {
    %c0_i32 = arith.constant 0 : i32
    %c0_i32_0 = arith.constant 0 : i32
    %c0_i32_1 = arith.constant 0 : i32
    return %c0_i32, %c0_i32_0 : i32, i32
  }
  func.func @transform_5(%arg0: i32) -> (i32, i32) {
    %c0_i32 = arith.constant 0 : i32
    %c0_i32_0 = arith.constant 0 : i32
    %c0_i32_1 = arith.constant 0 : i32
    return %c0_i32, %c0_i32_0 : i32, i32
  }
  func.func @transform_6(%arg0: i32) -> (i32, i32) {
    %c0_i32 = arith.constant 0 : i32
    %c0_i32_0 = arith.constant 0 : i32
    %c0_i32_1 = arith.constant 0 : i32
    return %c0_i32, %c0_i32_0 : i32, i32
  }
  func.func @transform_7(%arg0: i32) -> (i32, i32) {
    %c0_i32 = arith.constant 0 : i32
    %c0_i32_0 = arith.constant 0 : i32
    %c0_i32_1 = arith.constant 0 : i32
    return %c0_i32, %c0_i32_0 : i32, i32
  }
  func.func @transform_8(%arg0: i32) -> (i32, i32) {
    %c0_i32 = arith.constant 0 : i32
    %c0_i32_0 = arith.constant 0 : i32
    %c0_i32_1 = arith.constant 0 : i32
    return %c0_i32, %c0_i32_0 : i32, i32
  }
  func.func @transform_9(%arg0: i32) -> (i32, i32) {
    %c0_i32 = arith.constant 0 : i32
    %c0_i32_0 = arith.constant 0 : i32
    return %arg0, %c0_i32 : i32, i32
  }
}

module attributes {stable_mosaic.version = 11 : i64} {
  func.func @_fused_mlp_kernel(%arg0: i32, %arg1: memref<8x128xbf16, #tpu.memory_space<vmem>>, %arg2: memref<128x128xbf16, #tpu.memory_space<vmem>>, %arg3: memref<1x128xf32, #tpu.memory_space<vmem>>, %arg4: memref<128x128xbf16, #tpu.memory_space<vmem>>, %arg5: memref<1x128xf32, #tpu.memory_space<vmem>>, %arg6: memref<128x128xbf16, #tpu.memory_space<vmem>>, %arg7: memref<1x128xf32, #tpu.memory_space<vmem>>, %arg8: memref<128x128xbf16, #tpu.memory_space<vmem>>, %arg9: memref<1x128xf32, #tpu.memory_space<vmem>>, %arg10: memref<8x128xf32, #tpu.memory_space<vmem>>) attributes {dimension_semantics = [#tpu.dimension_semantics<parallel>], iteration_bounds = array<i64: 2>, scalar_prefetch = 0 : i64, scratch_operands = 0 : i64, tpu.core_type = #tpu.core_type<tc>, window_params = [{transform_indices = @transform_0, window_bounds = array<i64: 8, 128>}, {pipeline_mode = #tpu.pipeline_mode<synchronous>, transform_indices = @transform_1, window_bounds = array<i64: 128, 128>}, {pipeline_mode = #tpu.pipeline_mode<synchronous>, transform_indices = @transform_2, window_bounds = array<i64: 1, 128>}, {pipeline_mode = #tpu.pipeline_mode<synchronous>, transform_indices = @transform_3, window_bounds = array<i64: 128, 128>}, {pipeline_mode = #tpu.pipeline_mode<synchronous>, transform_indices = @transform_4, window_bounds = array<i64: 1, 128>}, {pipeline_mode = #tpu.pipeline_mode<synchronous>, transform_indices = @transform_5, window_bounds = array<i64: 128, 128>}, {pipeline_mode = #tpu.pipeline_mode<synchronous>, transform_indices = @transform_6, window_bounds = array<i64: 1, 128>}, {pipeline_mode = #tpu.pipeline_mode<synchronous>, transform_indices = @transform_7, window_bounds = array<i64: 128, 128>}, {pipeline_mode = #tpu.pipeline_mode<synchronous>, transform_indices = @transform_8, window_bounds = array<i64: 1, 128>}, {transform_indices = @transform_9, window_bounds = array<i64: 8, 128>}]} {
    %c0 = arith.constant 0 : index
    %c0_0 = arith.constant 0 : index
    %0 = vector.load %arg1[%c0, %c0_0] : memref<8x128xbf16, #tpu.memory_space<vmem>>, vector<8x128xbf16>
    %c0_1 = arith.constant 0 : index
    %c0_2 = arith.constant 0 : index
    %1 = vector.load %arg2[%c0_1, %c0_2] : memref<128x128xbf16, #tpu.memory_space<vmem>>, vector<128x128xbf16>
    %c0_3 = arith.constant 0 : index
    %c0_4 = arith.constant 0 : index
    %2 = vector.load %arg3[%c0_3, %c0_4] : memref<1x128xf32, #tpu.memory_space<vmem>>, vector<1x128xf32>
    %cst = arith.constant dense<0.000000e+00> : vector<8x128xf32>
    %3 = tpu.matmul %0, %1, %cst {dimension_numbers = #tpu.dot_dimension_numbers<[1], [0], [0], [1], [0, 0, 1, 1], [], []>} : vector<8x128xbf16>, vector<128x128xbf16>, vector<8x128xf32> -> vector<8x128xf32>
    %4 = vector.broadcast %2 : vector<1x128xf32> to vector<8x128xf32>
    %5 = arith.addf %3, %4 : vector<8x128xf32>
    %cst_5 = arith.constant 0.000000e+00 : f32
    %6 = vector.broadcast %cst_5 : f32 to vector<8x128xf32>
    %7 = arith.maximumf %5, %6 : vector<8x128xf32>
    %8 = arith.truncf %7 : vector<8x128xf32> to vector<8x128xbf16>
    %c0_6 = arith.constant 0 : index
    %c0_7 = arith.constant 0 : index
    %9 = vector.load %arg4[%c0_6, %c0_7] : memref<128x128xbf16, #tpu.memory_space<vmem>>, vector<128x128xbf16>
    %c0_8 = arith.constant 0 : index
    %c0_9 = arith.constant 0 : index
    %10 = vector.load %arg5[%c0_8, %c0_9] : memref<1x128xf32, #tpu.memory_space<vmem>>, vector<1x128xf32>
    %cst_10 = arith.constant dense<0.000000e+00> : vector<8x128xf32>
    %11 = tpu.matmul %8, %9, %cst_10 {dimension_numbers = #tpu.dot_dimension_numbers<[1], [0], [0], [1], [0, 0, 1, 1], [], []>} : vector<8x128xbf16>, vector<128x128xbf16>, vector<8x128xf32> -> vector<8x128xf32>
    %12 = vector.broadcast %10 : vector<1x128xf32> to vector<8x128xf32>
    %13 = arith.addf %11, %12 : vector<8x128xf32>
    %cst_11 = arith.constant 0.000000e+00 : f32
    %14 = vector.broadcast %cst_11 : f32 to vector<8x128xf32>
    %15 = arith.maximumf %13, %14 : vector<8x128xf32>
    %16 = arith.truncf %15 : vector<8x128xf32> to vector<8x128xbf16>
    %c0_12 = arith.constant 0 : index
    %c0_13 = arith.constant 0 : index
    %17 = vector.load %arg6[%c0_12, %c0_13] : memref<128x128xbf16, #tpu.memory_space<vmem>>, vector<128x128xbf16>
    %c0_14 = arith.constant 0 : index
    %c0_15 = arith.constant 0 : index
    %18 = vector.load %arg7[%c0_14, %c0_15] : memref<1x128xf32, #tpu.memory_space<vmem>>, vector<1x128xf32>
    %cst_16 = arith.constant dense<0.000000e+00> : vector<8x128xf32>
    %19 = tpu.matmul %16, %17, %cst_16 {dimension_numbers = #tpu.dot_dimension_numbers<[1], [0], [0], [1], [0, 0, 1, 1], [], []>} : vector<8x128xbf16>, vector<128x128xbf16>, vector<8x128xf32> -> vector<8x128xf32>
    %20 = vector.broadcast %18 : vector<1x128xf32> to vector<8x128xf32>
    %21 = arith.addf %19, %20 : vector<8x128xf32>
    %cst_17 = arith.constant 0.000000e+00 : f32
    %22 = vector.broadcast %cst_17 : f32 to vector<8x128xf32>
    %23 = arith.maximumf %21, %22 : vector<8x128xf32>
    %24 = arith.truncf %23 : vector<8x128xf32> to vector<8x128xbf16>
    %c0_18 = arith.constant 0 : index
    %c0_19 = arith.constant 0 : index
    %25 = vector.load %arg8[%c0_18, %c0_19] : memref<128x128xbf16, #tpu.memory_space<vmem>>, vector<128x128xbf16>
    %c0_20 = arith.constant 0 : index
    %c0_21 = arith.constant 0 : index
    %26 = vector.load %arg9[%c0_20, %c0_21] : memref<1x128xf32, #tpu.memory_space<vmem>>, vector<1x128xf32>
    %cst_22 = arith.constant dense<0.000000e+00> : vector<8x128xf32>
    %27 = tpu.matmul %24, %25, %cst_22 {dimension_numbers = #tpu.dot_dimension_numbers<[1], [0], [0], [1], [0, 0, 1, 1], [], []>} : vector<8x128xbf16>, vector<128x128xbf16>, vector<8x128xf32> -> vector<8x128xf32>
    %28 = vector.broadcast %26 : vector<1x128xf32> to vector<8x128xf32>
    %29 = arith.addf %27, %28 : vector<8x128xf32>
    %c0_23 = arith.constant 0 : index
    %c0_24 = arith.constant 0 : index
    %30 = vector.load %arg10[%c0_23, %c0_24] : memref<8x128xf32, #tpu.memory_space<vmem>>, vector<8x128xf32>
    tpu.vector_store %arg10[%c0_23, %c0_24], %29 {strides = array<i32>} : memref<8x128xf32, #tpu.memory_space<vmem>>, vector<8x128xf32>,
    return
  }
  func.func @transform_0(%arg0: i32) -> (i32, i32) {
    %c0_i32 = arith.constant 0 : i32
    %c0_i32_0 = arith.constant 0 : i32
    return %arg0, %c0_i32 : i32, i32
  }
  func.func @transform_1(%arg0: i32) -> (i32, i32) {
    %c0_i32 = arith.constant 0 : i32
    %c0_i32_0 = arith.constant 0 : i32
    %c0_i32_1 = arith.constant 0 : i32
    return %c0_i32, %c0_i32_0 : i32, i32
  }
  func.func @transform_2(%arg0: i32) -> (i32, i32) {
    %c0_i32 = arith.constant 0 : i32
    %c0_i32_0 = arith.constant 0 : i32
    %c0_i32_1 = arith.constant 0 : i32
    return %c0_i32, %c0_i32_0 : i32, i32
  }
  func.func @transform_3(%arg0: i32) -> (i32, i32) {
    %c0_i32 = arith.constant 0 : i32
    %c0_i32_0 = arith.constant 0 : i32
    %c0_i32_1 = arith.constant 0 : i32
    return %c0_i32, %c0_i32_0 : i32, i32
  }
  func.func @transform_4(%arg0: i32) -> (i32, i32) {
    %c0_i32 = arith.constant 0 : i32
    %c0_i32_0 = arith.constant 0 : i32
    %c0_i32_1 = arith.constant 0 : i32
    return %c0_i32, %c0_i32_0 : i32, i32
  }
  func.func @transform_5(%arg0: i32) -> (i32, i32) {
    %c0_i32 = arith.constant 0 : i32
    %c0_i32_0 = arith.constant 0 : i32
    %c0_i32_1 = arith.constant 0 : i32
    return %c0_i32, %c0_i32_0 : i32, i32
  }
  func.func @transform_6(%arg0: i32) -> (i32, i32) {
    %c0_i32 = arith.constant 0 : i32
    %c0_i32_0 = arith.constant 0 : i32
    %c0_i32_1 = arith.constant 0 : i32
    return %c0_i32, %c0_i32_0 : i32, i32
  }
  func.func @transform_7(%arg0: i32) -> (i32, i32) {
    %c0_i32 = arith.constant 0 : i32
    %c0_i32_0 = arith.constant 0 : i32
    %c0_i32_1 = arith.constant 0 : i32
    return %c0_i32, %c0_i32_0 : i32, i32
  }
  func.func @transform_8(%arg0: i32) -> (i32, i32) {
    %c0_i32 = arith.constant 0 : i32
    %c0_i32_0 = arith.constant 0 : i32
    %c0_i32_1 = arith.constant 0 : i32
    return %c0_i32, %c0_i32_0 : i32, i32
  }
  func.func @transform_9(%arg0: i32) -> (i32, i32) {
    %c0_i32 = arith.constant 0 : i32
    %c0_i32_0 = arith.constant 0 : i32
    return %arg0, %c0_i32 : i32, i32
  }
}

</mosaic_0001>

<bundles_post_ra>
// kernel: tpu_custom_call.1
= control target key start
LH: loop header
LB: loop body
LE: loop exit
PB: predicated region body
PF: predicated region fallthrough
CT: control target
= control target key end

     0   :  { %s1825_s0 = inlined_call_operand.hbm [shape: bf16[16,128], index: 0, kind: input, shape index: {}]   ;;  %s1826_s1 = inlined_call_operand.hbm [shape: bf16[128,128], index: 1, kind: input, shape index: {}]   ;;  %s1827_s2 = inlined_call_operand.vmem [shape: f32[1,128], index: 2, kind: input, shape index: {}]   ;;  %s1828_s3 = inlined_call_operand.hbm [shape: bf16[128,128], index: 3, kind: input, shape index: {}]   ;;  %s1829_s4 = inlined_call_operand.vmem [shape: f32[1,128], index: 4, kind: input, shape index: {}]   ;;  %s1830_s5 = inlined_call_operand.hbm [shape: bf16[128,128], index: 5, kind: input, shape index: {}]   ;;  %s1831_s6 = inlined_call_operand.vmem [shape: f32[1,128], index: 6, kind: input, shape index: {}]   ;;  %s1832_s7 = inlined_call_operand.hbm [shape: bf16[128,128], index: 7, kind: input, shape index: {}]   ;;  %s1833_s8 = inlined_call_operand.vmem [shape: f32[1,128], index: 8, kind: input, shape index: {}]   ;;  %s1834_s9 = inlined_call_operand.hbm [shape: f32[16,128], index: 9, kind: output, shape index: {}]  }
   0x1   :  { %1839 = sst [smem:[#allocation16_spill]] %s1826_s1 }
   0x2   :  { %1840 = sst [smem:[#allocation17_spill]] %s1828_s3 }
   0x3   :  { %1841 = sst [smem:[#allocation18_spill]] %s1830_s5 }
   0x4   :  { %1842 = sst [smem:[#allocation19_spill]] %s1832_s7 }
   0x5   :  { %14 = vsyncpa [#allocation3], 0 }
   0x6   :  { %16 = vsyncpa [#allocation3 + $0x1], 0 }
   0x7   :  { %17 = vsyncpa [#allocation6], 0 }
   0x8   :  { %18 = vsyncpa [#allocation9], 0 }
   0x9   :  { %19 = vsyncpa [#allocation4], 0 }
   0xa   :  { %21 = vsyncpa [#allocation4 + $0x1], 0  ;;  %s1542_s30 = smov 0   ;;  %s1544_s10 = smov 0  }
   0xb   :  { %s1546_s11 = smov 0   ;;  %s1548_s12 = smov 0  }
   0xc LB: > { %s1482_s13 = smov [#allocation5]   ;;  %s1563_s15 = sadd.s32 4294967295, %s1480_s12   ;;  %s1480_s12 = sphi %s1548_s12, %s1866_s12   ;;  %s1476_s11 = sphi %s1546_s11, %s1865_s11   ;;  %s1472_s10 = sphi %s1544_s10, %s1864_s10   ;;  %s1468_s30 = sphi %s1542_s30, %s1863_s30  }
   0xd   : > { %s264_s14 = sshll.u32 %s1482_s13, 4  ;;  %p982_p0 = scmp.ge.s32.totalorder %s1480_s12, 1  ;;  %s265_s14 = int_to_ptr.vmem [resolvable:$true] %s264_s14 }
   0xe   : > { %p1835_p1 = scmp.eq.s32.totalorder %s1563_s15, 0  ;;  %p252_p2 = scmp.lt.s32.totalorder %s1480_s12, 3 }
   0xf   : > { %s1483_s17 = smov [#allocation8]   ;;  %s1484_s20 = smov [#allocation7]  }
  0x10   : > { %p1568_p3 = pnand %p982_p0, %p252_p2  ;;  %s296_s18 = sshll.u32 %s1483_s17, 4  ;;  %s1581_s18 = int_to_ptr.vmem [resolvable:$true] %s296_s18 }
  0x11   : > { %s280_s21 = sshll.u32 %s1484_s20, 4  ;;  %s1287_s22 = scalar_lea.vmem %s265_s14, 1024  ;;  %s1583_s21 = int_to_ptr.vmem [resolvable:$true] %s280_s21 }
  0x12   : > { %s1843_s16 = scalar_select %p1568_p3, 1, 0 }
  0x13   : > { %p1173_p5 = pneg %p1568_p3  ;;  %p1288_p8 = scmp.ne.s32.totalorder %s265_s14, %s1287_s22 }
  0x14   : > { %p1295_p11 = scmp.lt.s32.totalorder %s265_s14, %s265_s14  ;;  %p1296_p12 = scmp.lt.s32.totalorder %s1287_s22, %s1287_s22 }
  0x15   : > { %p1577_p6 = pnand %p1173_p5, %p1835_p1 }
  0x16   : > { %p1297_p13 = por %p1296_p12, %p1295_p11 }
  0x17   : > { %p1278_p7 = pneg %p1577_p6 }
  0x19   : > { %p1290_p9 = pnand %p1288_p8, %p1278_p7 }
  0x1b   : > { %p1291_p10 = pneg %p1290_p9 }
  0x1d   : > { %p1298_p0 = pnand %p1297_p13, %p1291_p10 }
  0x1f   : > { %1301 = shalt.err (!%p1298_p0)
}
  0x20   : > { %s1485_s23 = smov 64   ;;  %s1486_s24 = smov 4  }
  0x21   : > { %s1845_s1 = sld [smem:[#allocation16_spill]]  ;;  %s1313_s27 = scalar_lea.vmem %s1581_s18, 1024 }
  0x22   : > { %p1314_p2 = scmp.ne.s32.totalorder %s1581_s18, %s1313_s27  ;;  %p1321_p9 = scmp.lt.s32.totalorder %s1581_s18, %s1581_s18 }
  0x23   : > { %p1322_p10 = scmp.lt.s32.totalorder %s1313_s27, %s1313_s27 }
  0x24   : > { %p1316_p5 = pnand %p1314_p2, %p1278_p7 }
  0x25   : > { %p1323_p11 = por %p1322_p10, %p1321_p9 }
  0x26   : > { %p1317_p8 = pneg %p1316_p5 }
  0x27   : > { %1176 = dma.hbm_to_vmem [thread:$0]  (!%p1577_p6), %s1845_s1, 1024, %s265_s14, [#allocation6], %s1485_s23, %s1485_s23, %s1486_s24  }
  0x28   : > { %p1324_p12 = pnand %p1323_p11, %p1317_p8 }
  0x2a   : > { %1327 = shalt.err (!%p1324_p12)
}
  0x2b   : > { %s1846_s5 = sld [smem:[#allocation18_spill]]  ;;  %s1339_s13 = scalar_lea.vmem %s1583_s21, 1024 }
  0x2c   : > { %p1340_p13 = scmp.ne.s32.totalorder %s1583_s21, %s1339_s13  ;;  %p1347_p5 = scmp.lt.s32.totalorder %s1583_s21, %s1583_s21 }
  0x2d   : > { %p1348_p8 = scmp.lt.s32.totalorder %s1339_s13, %s1339_s13 }
  0x2e   : > { %p1342_p0 = pnand %p1340_p13, %p1278_p7 }
  0x2f   : > { %p1349_p9 = por %p1348_p8, %p1347_p5 }
  0x30   : > { %p1343_p2 = pneg %p1342_p0 }
  0x31   : > { %1182 = dma.hbm_to_vmem [thread:$0]  (!%p1577_p6), %s1846_s5, 1024, %s1581_s18, [#allocation9], %s1485_s23, %s1485_s23, %s1486_s24  }
  0x32   : > { %p1350_p10 = pnand %p1349_p9, %p1343_p2 }
  0x34   : > { %1353 = shalt.err (!%p1350_p10)
}
  0x35   : > { %s1847_s3 = sld [smem:[#allocation17_spill]]  ;;  %s1487_s18 = smov [#allocation10]  }
  0x36   : > { %s312_s20 = sshll.u32 %s1487_s18, 4  ;;  %s313_s20 = int_to_ptr.vmem [resolvable:$true] %s312_s20 }
  0x37   : > { %s1365_s22 = scalar_lea.vmem %s313_s20, 1024  ;;  %p1373_p0 = scmp.lt.s32.totalorder %s313_s20, %s313_s20 }
  0x38   : > { %p1366_p11 = scmp.ne.s32.totalorder %s313_s20, %s1365_s22  ;;  %p1374_p2 = scmp.lt.s32.totalorder %s1365_s22, %s1365_s22 }
  0x3a   : > { %p1368_p12 = pnand %p1366_p11, %p1278_p7  ;;  %p1375_p5 = por %p1374_p2, %p1373_p0 }
  0x3b   : > { %1179 = dma.hbm_to_vmem [thread:$0]  (!%p1577_p6), %s1847_s3, 1024, %s1583_s21, [#allocation6], %s1485_s23, %s1485_s23, %s1486_s24  }
  0x3c   : > { %p1369_p13 = pneg %p1368_p12 }
  0x3e   : > { %p1376_p8 = pnand %p1375_p5, %p1369_p13 }
  0x40   : > { %1379 = shalt.err (!%p1376_p8)
}
  0x41   : > { %s1848_s7 = sld [smem:[#allocation19_spill]]  ;;  %s981_s19 = sadd.s32 4294967294, %s1480_s12  }
  0x42   : > { %s1643_s26 = sadd.s32 1, %s1480_s12   ;;  %s34_s28 = sadd.s32 1, %s1476_s11 }
  0x43   : > { %s31_s27 = ssub.s32 %s1480_s12, %s1643_s26  ;;  %p41_p9 = scmp.ne.s32.totalorder %s1476_s11, %s1472_s10 }
  0x44   : > { %p32_p7 = scmp.eq.s32.totalorder %s31_s27, 0  ;;  %p42_p10 = scmp.eq.s32.totalorder %s1480_s12, 0 }
  0x45   : > { %p47_p11 = scmp.ne.s32.totalorder %s1472_s10, %s1468_s30  ;;  %p239_p13 = scmp.eq.s32.totalorder %s1563_s15, 1 }
  0x46   : > { %s1654_s29 = scalar_select %p32_p7, %s1476_s11, %s34_s28  }
  0x47   : > { %1185 = dma.hbm_to_vmem [thread:$0]  (!%p1577_p6), %s1848_s7, 1024, %s313_s20, [#allocation9], %s1485_s23, %s1485_s23, %s1486_s24  }
  0x48   : > { %p1656_p12 = por %p42_p10, %p41_p9  ;;  %p1662_p6 = por %p1835_p1, %p47_p11 }
  0x49   : > { %p245_p0 = scmp.eq.s32.totalorder %s981_s19, 1  ;;  %p1198_p2 = scmp.lt.s32.totalorder %s1480_s12, 2 }
  0x4a   : > { %s1850_s23 = scalar_select %p1662_p6, 1, 0 }
  0x4b   : > { %s329_s24 = sand.u32 1, %s1476_s11   ;;  %p1669_p5 = por %p239_p13, %p41_p9 }
  0x4c   : > { %p1673_p8 = por %p245_p0, %p47_p11  ;;  %s988_s18 = sshll.u32 %s329_s24, 2 }
  0x4d   : > { %s1851_s14 = scalar_select %p1669_p5, 1, 0 }
  0x4e   : > { %s1852_s17 = scalar_select %p1673_p8, 1, 0 }
  0x4f   : > { %s989_s20 = sshll.u32 %s1480_s12, 6  ;;  %s333_s19 = scalar_lea.vmem [#allocation2], %s988_s18 }
  0x50   : > { %s1681_s25 = scalar_lea.hbm %s1825_s0, %s989_s20  ;;  %s340_s27 = sshll.u32 %s333_s19, 4  ;;  %s341_s27 = int_to_ptr.vmem [resolvable:$true] %s340_s27 }
  0x51   : > { %p1685_p7 = pnand %p1198_p2, %p1656_p12  ;;  %s330_s1 = scalar_lea.sflag [#allocation3], %s329_s24 }
  0x52   : > { %s1380_s3 = scalar_lea.hbm %s1681_s25, 64  ;;  %s1385_s21 = scalar_lea.hbm %s1825_s0, 128 }
  0x53   : > { %p1381_p9 = scmp.ne.s32.totalorder %s1681_s25, %s1380_s3  ;;  %p1382_p10 = pneg %p1685_p7 }
  0x54   : > { %p1386_p0 = scmp.lt.s32.totalorder %s1681_s25, %s1825_s0  ;;  %p1387_p12 = scmp.lt.s32.totalorder %s1385_s21, %s1380_s3 }
  0x55   : > { %p1383_p11 = pnand %p1382_p10, %p1381_p9 }
  0x56   : > { %p1388_p2 = por %p1387_p12, %p1386_p0 }
  0x57   : > { %p1384_p13 = pneg %p1383_p11 }
  0x59   : > { %p1389_p4 = pnand %p1388_p2, %p1384_p13 }
  0x5b   : > { %1392 = shalt.err (!%p1389_p4)
}
  0x5c   : > { %s1393_s13 = scalar_lea.vmem %s341_s27, 64  ;;  %s1488_s24 = smov [#allocation2]  }
  0x5d   : > { %p1394_p1 = scmp.ne.s32.totalorder %s341_s27, %s1393_s13  ;;  %s1398_s5 = sshll.u32 %s1488_s24, 4  ;;  %s1399_s5 = int_to_ptr.vmem [resolvable:$false] %s1398_s5 }
  0x5e   : > { %s1400_s7 = scalar_lea.vmem %s1399_s5, 128  ;;  %p1401_p9 = scmp.lt.s32.totalorder %s341_s27, %s1399_s5 }
  0x5f   : > { %p1396_p8 = pnand %p1394_p1, %p1382_p10  ;;  %p1402_p11 = scmp.lt.s32.totalorder %s1400_s7, %s1393_s13 }
  0x61   : > { %p1397_p5 = pneg %p1396_p8  ;;  %p1403_p6 = por %p1402_p11, %p1401_p9 }
  0x63   : > { %p1404_p3 = pnand %p1403_p6, %p1397_p5 }
  0x65   : > { %1407 = shalt.err (!%p1404_p3)
}
  0x66   : > { %1189 = dma.hbm_to_vmem [thread:$0]  (!%p1685_p7), %s1681_s25, 64, %s341_s27, %s330_s1  }
  0x67   : > { %p1854_p13 = scmp.ne.s32.totalorder %s1843_s16, 0 }
  0x68   : > { %s1706_s3 = sand.u32 (!%p1854_p13), 1, %s1472_s10   ;;  %p1855_p1 = scmp.ne.s32.totalorder (!%p1854_p13), %s1850_s23, 0 }
  0x69   : > { %349 = sbr.rel (%p1854_p13) target bundleno = 957 (0x3bd), region = 56  ;;  %s991_s20 = sshll.u32 (!%p1854_p13), %s1706_s3, 2 }
  0x6a   : > { %s352_s22 = scalar_lea.sflag (!%p1854_p13), [#allocation3], %s1706_s3  ;;  %s1710_s5 = scalar_lea.vmem (!%p1854_p13), [#allocation2], %s991_s20 }
  0x6e   : > { %1451 = dma.done.wait (%p1855_p1), %s352_s22, 64  }
  0x6f   : > { %1453 = vsyncadd (%p1855_p1), %s352_s22, 4294967232  ;;  %p1856_p3 = scmp.eq.s32.totalorder %s1563_s15, 0 }
  0x71   : > { %1455 = dma.done.wait (%p1856_p3), [#allocation6], 2048   ;;  %p1857_p4 = pmov %p1856_p3 }
  0x72   : > { %p1858_p6 = pmov %p1856_p3 }
  0x73   : > { %1457 = vsyncadd (%p1857_p4), [#allocation6], 4294965248 }
  0x74   : > { %1459 = dma.done.wait (%p1858_p6), [#allocation9], 2048   ;;  %p1859_p5 = pmov %p1856_p3 }
  0x75   : > { %v1489_v0 = vmov 0.0   ;;  %vm1490_vm0 = vmmov 0   ;;  %v1244_v1 = vld [vmem:[#allocation5 + $0x38] sm:$0xff]   ;;  %v1245_v2 = vld [vmem:[#allocation5 + $0x30] sm:$0xff]   ;;  %v1246_v3 = vld [vmem:[#allocation5 + $0x28] sm:$0xff]   ;;  %s996_s28 = sshll.u32 %s1706_s3, 3 }
  0x76   : > { %1461 = vsyncadd (%p1859_p5), [#allocation9], 4294965248  ;;  %1073 = vmatprep.subr.bf16.mxu0 %v1489_v0  ;;  %1089 = vmatprep.mubr.msk.bf16.mxu0 %vm1490_vm0, %v1489_v0  ;;  %v1252_v4 = vld [vmem:[#allocation7 + $0x38] sm:$0xff]   ;;  %v1247_v5 = vld [vmem:[#allocation5 + $0x20] sm:$0xff]   ;;  %s1034_s19 = sshll.u32 %s1563_s15, 7  ;;  %s405_s13 = scalar_lea.vmem [#allocation11], %s996_s28 }
  0x77   : > { %1093 = vmatprep.subr.bf16.mxu1 %v1489_v0  ;;  %1109 = vmatprep.mubr.msk.bf16.mxu1 %vm1490_vm0, %v1489_v0  ;;  %v1253_v6 = vld [vmem:[#allocation7 + $0x30] sm:$0xff]   ;;  %v1248_v7 = vld [vmem:[#allocation5 + $0x18] sm:$0xff]   ;;  %v1254_v8 = vld [vmem:[#allocation7 + $0x28] sm:$0xff]   ;;  %s873_s24 = sshll.u32 %s405_s13, 4  ;;  %s860_s1 = scalar_lea.sflag [#allocation4], %s1706_s3  ;;  %s1784_s24 = int_to_ptr.vmem [resolvable:$true] %s873_s24 }
  0x78   : > { %1074 = vmatpush3.bf16.msra.mxu0 %v1244_v1  ;;  %1094 = vmatpush3.bf16.msra.mxu1 %v1252_v4  ;;  %v1249_v9 = vld [vmem:[#allocation5 + $0x10] sm:$0xff]   ;;  %v1255_v10 = vld [vmem:[#allocation7 + $0x20] sm:$0xff]   ;;  %v1250_v11 = vld [vmem:[#allocation5 + $0x8] sm:$0xff]   ;;  %s1408_s7 = scalar_lea.vmem %s1784_s24, 128  ;;  %p1860_p7 = scmp.ne.s32.totalorder %s1851_s14, 0 }
  0x79   : > { %1075 = vmatprep.subr.bf16.mxu0 %v1489_v0  ;;  %1095 = vmatprep.subr.bf16.mxu1 %v1489_v0  ;;  %v1256_v12 = vld [vmem:[#allocation7 + $0x18] sm:$0xff]   ;;  %v1251_v13 = vld [vmem:[#allocation5] sm:$0xff]   ;;  %v1257_v14 = vld [vmem:[#allocation7 + $0x10] sm:$0xff]   ;;  %p1409_p8 = scmp.ne.s32.totalorder %s1784_s24, %s1408_s7  ;;  %s1491_s15 = smov [#allocation11]  }
  0x7a   : > { %v407_v15 = vld [vmem:[%s1710_s5] sm:$0xf]  ;;  %v1258_v16 = vld [vmem:[#allocation7 + $0x8] sm:$0xff]   ;;  %v1259_v17 = vld [vmem:[#allocation7] sm:$0xff]   ;;  %s1782_s5 = scalar_lea.hbm %s1834_s9, %s1034_s19  ;;  %s1412_s16 = sshll.u32 %s1491_s15, 4  ;;  %s1413_s16 = int_to_ptr.vmem [resolvable:$false] %s1412_s16 }
  0x7b   : > { %v1260_v18 = vld [vmem:[#allocation8 + $0x38] sm:$0xff]   ;;  %v1261_v19 = vld [vmem:[#allocation8 + $0x30] sm:$0xff]   ;;  %v1262_v20 = vld [vmem:[#allocation8 + $0x28] sm:$0xff]   ;;  %p1410_p10 = pnand %p1409_p8, %p1860_p7  ;;  %s1414_s23 = scalar_lea.vmem %s1413_s16, 256 }
  0x7c   : > { %1076 = vmatpush3.bf16.msra.mxu0 %v1245_v2  ;;  %1096 = vmatpush3.bf16.msra.mxu1 %v1253_v6  ;;  %v1263_v21 = vld [vmem:[#allocation8 + $0x20] sm:$0xff]   ;;  %v1264_v22 = vld [vmem:[#allocation8 + $0x18] sm:$0xff]   ;;  %v1265_v23 = vld [vmem:[#allocation8 + $0x10] sm:$0xff]   ;;  %p1415_p12 = scmp.lt.s32.totalorder %s1784_s24, %s1413_s16  ;;  %p1416_p2 = scmp.lt.s32.totalorder %s1414_s23, %s1408_s7 }
  0x7d   : > { %1077 = vmatprep.subr.bf16.mxu0 %v1489_v0  ;;  %1097 = vmatprep.subr.bf16.mxu1 %v1489_v0  ;;  %v997_v24 = vld [vmem:[%s1827_s2] ss:$0 sm:$0xff]  ;;  %v1266_v32 = vld [vmem:[#allocation8 + $0x8] sm:$0xff]   ;;  %v1267_v33 = vld [vmem:[#allocation8] sm:$0xff]   ;;  %p1411_p0 = pneg %p1410_p10 }
  0x7e   : > { %v1268_v34 = vld [vmem:[#allocation10 + $0x38] sm:$0xff]   ;;  %v1269_v35 = vld [vmem:[#allocation10 + $0x30] sm:$0xff]   ;;  %v1270_v36 = vld [vmem:[#allocation10 + $0x28] sm:$0xff]   ;;  %p1417_p9 = por %p1416_p2, %p1415_p12 }
  0x7f   : > { %v1271_v37 = vld [vmem:[#allocation10 + $0x20] sm:$0xff]   ;;  %v1272_v38 = vld [vmem:[#allocation10 + $0x18] sm:$0xff]   ;;  %v1273_v39 = vld [vmem:[#allocation10 + $0x10] sm:$0xff]  }
  0x80   : > { %1078 = vmatpush3.bf16.msra.mxu0 %v1246_v3  ;;  %1098 = vmatpush3.bf16.msra.mxu1 %v1254_v8  ;;  %v1006_v40 = vld [vmem:[%s1829_s4] ss:$0 sm:$0xff]  ;;  %v1274_v48 = vld [vmem:[#allocation10 + $0x8] sm:$0xff]   ;;  %v1275_v49 = vld [vmem:[#allocation10] sm:$0xff]   ;;  %p1418_p11 = pnand %p1417_p9, %p1411_p0 }
  0x81   : > { %1079 = vmatprep.subr.bf16.mxu0 %v1489_v0  ;;  %1099 = vmatprep.subr.bf16.mxu1 %v1489_v0  ;;  %v1015_v50 = vld [vmem:[%s1831_s6] ss:$0 sm:$0xff] }
  0x82   : > { %v1024_v58 = vld [vmem:[%s1833_s8] ss:$0 sm:$0xff] }
  0x84   : > { %1080 = vmatpush3.bf16.msra.mxu0 %v1247_v5  ;;  %1100 = vmatpush3.bf16.msra.mxu1 %v1255_v10 }
  0x85   : > { %1081 = vmatprep.subr.bf16.mxu0 %v1489_v0  ;;  %1101 = vmatprep.subr.bf16.mxu1 %v1489_v0 }
  0x88   : > { %1082 = vmatpush3.bf16.msra.mxu0 %v1248_v7  ;;  %1102 = vmatpush3.bf16.msra.mxu1 %v1256_v12 }
  0x89   : > { %1083 = vmatprep.subr.bf16.mxu0 %v1489_v0  ;;  %1103 = vmatprep.subr.bf16.mxu1 %v1489_v0 }
  0x8c   : > { %1084 = vmatpush3.bf16.msra.mxu0 %v1249_v9  ;;  %1104 = vmatpush3.bf16.msra.mxu1 %v1257_v14 }
  0x8d   : > { %1085 = vmatprep.subr.bf16.mxu0 %v1489_v0  ;;  %1105 = vmatprep.subr.bf16.mxu1 %v1489_v0 }
  0x90   : > { %1086 = vmatpush3.bf16.msra.mxu0 %v1250_v11  ;;  %1106 = vmatpush3.bf16.msra.mxu1 %v1258_v16 }
  0x91   : > { %1087 = vmatprep.subr.bf16.mxu0 %v1489_v0  ;;  %1107 = vmatprep.subr.bf16.mxu1 %v1489_v0 }
  0x94   : > { %1088 = vmatpush3.bf16.msra.mxu0 %v1251_v13  ;;  %1108 = vmatpush3.bf16.msra.mxu1 %v1259_v17 }
  0x95   : > { %1113 = vmatprep.subr.bf16.mxu0 %v1489_v0  ;;  %1133 = vmatprep.subr.bf16.mxu1 %v1489_v0 }
  0x97   : > { %1090 = vmatmul.mubr.bf16.vlgmr.msra.gmra.mxu0 %v407_v15 }
  0x98   : > { %1129 = vmatprep.mubr.msk.bf16.mxu0 %vm1490_vm0, %v1489_v0  ;;  %1114 = vmatpush3.bf16.msra.mxu0 %v1260_v18 }
  0x99   : > { %1115 = vmatprep.subr.bf16.mxu0 %v1489_v0 }
  0x9c   : > { %1116 = vmatpush3.bf16.msra.mxu0 %v1261_v19 }
  0x9d   : > { %1117 = vmatprep.subr.bf16.mxu0 %v1489_v0 }
  0xa0   : > { %1118 = vmatpush3.bf16.msra.mxu0 %v1262_v20 }
  0xa1   : > { %1119 = vmatprep.subr.bf16.mxu0 %v1489_v0 }
  0xa4   : > { %1120 = vmatpush3.bf16.msra.mxu0 %v1263_v21 }
  0xa5   : > { %1121 = vmatprep.subr.bf16.mxu0 %v1489_v0 }
  0xa8   : > { %1122 = vmatpush3.bf16.msra.mxu0 %v1264_v22 }
  0xa9   : > { %1123 = vmatprep.subr.bf16.mxu0 %v1489_v0 }
  0xac   : > { %1124 = vmatpush3.bf16.msra.mxu0 %v1265_v23 }
  0xad   : > { %1125 = vmatprep.subr.bf16.mxu0 %v1489_v0 }
  0xb0   : > { %1126 = vmatpush3.bf16.msra.mxu0 %v1266_v32 }
  0xb1   : > { %1127 = vmatprep.subr.bf16.mxu0 %v1489_v0 }
  0xb4   : > { %1128 = vmatpush3.bf16.msra.mxu0 %v1267_v33 }
 0x157   : > { %v513_v25 = vpop.f32.mrf.mxu0 }
 0x158   : > { %v514_v26 = vadd.f32 %v997_v24, %v513_v25 }
 0x159   : > { %v1091_v27 = vpop.f32.mrf.mxu0 }
 0x15a   : > { %v519_v28 = vmax.f32 %v514_v26, 0.0 }
 0x15b   : > { %v516_v29 = vpop.f32.mrf.mxu0 }
 0x15c   : > { %v520_v30 = vpack.c.bf16 %v519_v28, %v519_v28 }
 0x15d   : > { %v1092_v31 = vpop.f32.mrf.mxu0 }
 0x15e   : > { %1110 = vmatmul.mubr.bf16.vlgmr.msra.gmra.mxu1 %v520_v30 }
 0x15f   : > { %1149 = vmatprep.mubr.msk.bf16.mxu1 %vm1490_vm0, %v1489_v0  ;;  %1134 = vmatpush3.bf16.msra.mxu1 %v1268_v34 }
 0x160   : > { %1135 = vmatprep.subr.bf16.mxu1 %v1489_v0 }
 0x163   : > { %1136 = vmatpush3.bf16.msra.mxu1 %v1269_v35 }
 0x164   : > { %1137 = vmatprep.subr.bf16.mxu1 %v1489_v0 }
 0x167   : > { %1138 = vmatpush3.bf16.msra.mxu1 %v1270_v36 }
 0x168   : > { %1139 = vmatprep.subr.bf16.mxu1 %v1489_v0 }
 0x16b   : > { %1140 = vmatpush3.bf16.msra.mxu1 %v1271_v37 }
 0x16c   : > { %1141 = vmatprep.subr.bf16.mxu1 %v1489_v0 }
 0x16f   : > { %1142 = vmatpush3.bf16.msra.mxu1 %v1272_v38 }
 0x170   : > { %1143 = vmatprep.subr.bf16.mxu1 %v1489_v0 }
 0x173   : > { %1144 = vmatpush3.bf16.msra.mxu1 %v1273_v39 }
 0x174   : > { %1145 = vmatprep.subr.bf16.mxu1 %v1489_v0 }
 0x177   : > { %1146 = vmatpush3.bf16.msra.mxu1 %v1274_v48 }
 0x178   : > { %1147 = vmatprep.subr.bf16.mxu1 %v1489_v0 }
 0x17b   : > { %1148 = vmatpush3.bf16.msra.mxu1 %v1275_v49 }
 0x21e   : > { %v626_v41 = vpop.f32.mrf.mxu1 }
 0x21f   : > { %v627_v42 = vadd.f32 %v1006_v40, %v626_v41 }
 0x220   : > { %v1111_v43 = vpop.f32.mrf.mxu1 }
 0x221   : > { %v632_v44 = vmax.f32 %v627_v42, 0.0 }
 0x222   : > { %v629_v45 = vpop.f32.mrf.mxu1 }
 0x223   : > { %v633_v46 = vpack.c.bf16 %v632_v44, %v632_v44 }
 0x224   : > { %v1112_v47 = vpop.f32.mrf.mxu1 }
 0x225   : > { %1130 = vmatmul.mubr.bf16.vlgmr.msra.gmra.mxu0 %v633_v46 }
 0x2e5   : > { %v739_v51 = vpop.f32.mrf.mxu0 }
 0x2e6   : > { %v740_v52 = vadd.f32 %v1015_v50, %v739_v51 }
 0x2e7   : > { %v1131_v53 = vpop.f32.mrf.mxu0 }
 0x2e8   : > { %v745_v54 = vmax.f32 %v740_v52, 0.0 }
 0x2e9   : > { %v742_v55 = vpop.f32.mrf.mxu0 }
 0x2ea   : > { %v746_v56 = vpack.c.bf16 %v745_v54, %v745_v54 }
 0x2eb   : > { %v1132_v57 = vpop.f32.mrf.mxu0 }
 0x2ec   : > { %1150 = vmatmul.mubr.bf16.vlgmr.msra.gmra.mxu1 %v746_v56 }
 0x3ac   : > { %v852_v59 = vpop.f32.mrf.mxu1 }
 0x3ad   : > { %v853_v60 = vadd.f32 %v1024_v58, %v852_v59 }
 0x3ae   : > { %v1151_v61 = vpop.f32.mrf.mxu1 }
 0x3af   : > { %858 = vst [vmem:[%s405_s13] sm:$0xff] %v853_v60 }
 0x3b0   : > { %v855_v62 = vpop.f32.mrf.mxu1 }
 0x3b1   : > { %1421 = shalt.err (!%p1418_p11)
}
 0x3b2   : > { %s1422_s25 = scalar_lea.hbm %s1782_s5, 128  ;;  %s1426_s28 = scalar_lea.hbm %s1834_s9, 256 }
 0x3b3   : > { %p1423_p13 = scmp.ne.s32.totalorder %s1782_s5, %s1422_s25  ;;  %p1427_p4 = scmp.lt.s32.totalorder %s1782_s5, %s1834_s9 }
 0x3b4   : > { %p1428_p6 = scmp.lt.s32.totalorder %s1426_s28, %s1422_s25 }
 0x3b5   : > { %p1424_p1 = pnand %p1423_p13, %p1860_p7 }
 0x3b6   : > { %p1429_p5 = por %p1428_p6, %p1427_p4 }
 0x3b7   : > { %p1425_p3 = pneg %p1424_p1 }
 0x3b9   : > { %p1430_p8 = pnand %p1429_p5, %p1425_p3 }
 0x3bb   : > { %1433 = shalt.err (!%p1430_p8)
}
 0x3bc   : > { %1171 = dma.vmem_to_hbm [thread:$0]  (%p1860_p7), %s1784_s24, 128, %s1782_s5, %s860_s1   ;;  %v1152_v63 = vpop.f32.mrf.mxu1 }
 0x3bd PF: > { %s885_s19 = sand.u32 1, %s1468_s30   ;;  %p1861_p10 = scmp.ne.s32.totalorder %s1852_s17, 0 }
 0x3be   : > { %p1862_p0 = scmp.ge.s32.totalorder %s1480_s12, 2  ;;  %s886_s13 = scalar_lea.sflag [#allocation4], %s885_s19 }
 0x3c0   : > { %p1191_p12 = pnand %p1862_p0, %p1861_p10 }
 0x3c2   : > { %p1192_p2 = pneg %p1191_p12 }
 0x3c4   : > { %1463 = dma.done.wait (%p1192_p2), %s886_s13, 128  }
 0x3c5   : > { %1465 = vsyncadd (%p1192_p2), %s886_s13, 4294967168  ;;  %p24_p9 = scmp.ge.s32.totalorder %s1643_s26, 4   ;;  %s1863_s30 = smov %s1472_s10 }
 0x3c6   : > { %s1864_s10 = smov %s1476_s11  ;;  %s1865_s11 = smov %s1654_s29 }
 0x3c7   : > { %s1866_s12 = smov %s1643_s26  ;;  %26 = sbr.rel (!%p24_p9) target bundleno = 12 (0xc), region = 117 }
 0x3cc   :  { %891 = vsyncpa [#allocation3], 1 }
 0x3cd   :  { %893 = vsyncpa [#allocation3 + $0x1], 1 }
 0x3ce   :  { %894 = vsyncpa [#allocation6], 1 }
 0x3cf   :  { %895 = vsyncpa [#allocation9], 1 }
 0x3d0   :  { %896 = vsyncpa [#allocation4], 1 }
 0x3d1   :  { %898 = vsyncpa [#allocation4 + $0x1], 1 }

// kernel: tpu_custom_call.1
= control target key start
LH: loop header
LB: loop body
LE: loop exit
PB: predicated region body
PF: predicated region fallthrough
CT: control target
= control target key end

     0   :  { %s1825_s0 = inlined_call_operand.hbm [shape: bf16[16,128], index: 0, kind: input, shape index: {}]   ;;  %s1826_s1 = inlined_call_operand.hbm [shape: bf16[128,128], index: 1, kind: input, shape index: {}]   ;;  %s1827_s2 = inlined_call_operand.vmem [shape: f32[1,128], index: 2, kind: input, shape index: {}]   ;;  %s1828_s3 = inlined_call_operand.hbm [shape: bf16[128,128], index: 3, kind: input, shape index: {}]   ;;  %s1829_s4 = inlined_call_operand.vmem [shape: f32[1,128], index: 4, kind: input, shape index: {}]   ;;  %s1830_s5 = inlined_call_operand.hbm [shape: bf16[128,128], index: 5, kind: input, shape index: {}]   ;;  %s1831_s6 = inlined_call_operand.vmem [shape: f32[1,128], index: 6, kind: input, shape index: {}]   ;;  %s1832_s7 = inlined_call_operand.hbm [shape: bf16[128,128], index: 7, kind: input, shape index: {}]   ;;  %s1833_s8 = inlined_call_operand.vmem [shape: f32[1,128], index: 8, kind: input, shape index: {}]   ;;  %s1834_s9 = inlined_call_operand.hbm [shape: f32[16,128], index: 9, kind: output, shape index: {}]  }
   0x1   :  { %1839 = sst [smem:[#allocation16_spill]] %s1826_s1 }
   0x2   :  { %1840 = sst [smem:[#allocation17_spill]] %s1828_s3 }
   0x3   :  { %1841 = sst [smem:[#allocation18_spill]] %s1830_s5 }
   0x4   :  { %1842 = sst [smem:[#allocation19_spill]] %s1832_s7 }
   0x5   :  { %14 = vsyncpa [#allocation3], 0 }
   0x6   :  { %16 = vsyncpa [#allocation3 + $0x1], 0 }
   0x7   :  { %17 = vsyncpa [#allocation6], 0 }
   0x8   :  { %18 = vsyncpa [#allocation9], 0 }
   0x9   :  { %19 = vsyncpa [#allocation4], 0 }
   0xa   :  { %21 = vsyncpa [#allocation4 + $0x1], 0  ;;  %s1542_s30 = smov 0   ;;  %s1544_s10 = smov 0  }
   0xb   :  { %s1546_s11 = smov 0   ;;  %s1548_s12 = smov 0  }
   0xc LB: > { %s1482_s13 = smov [#allocation5]   ;;  %s1563_s15 = sadd.s32 4294967295, %s1480_s12   ;;  %s1480_s12 = sphi %s1548_s12, %s1866_s12   ;;  %s1476_s11 = sphi %s1546_s11, %s1865_s11   ;;  %s1472_s10 = sphi %s1544_s10, %s1864_s10   ;;  %s1468_s30 = sphi %s1542_s30, %s1863_s30  }
   0xd   : > { %s264_s14 = sshll.u32 %s1482_s13, 4  ;;  %p982_p0 = scmp.ge.s32.totalorder %s1480_s12, 1  ;;  %s265_s14 = int_to_ptr.vmem [resolvable:$true] %s264_s14 }
   0xe   : > { %p1835_p1 = scmp.eq.s32.totalorder %s1563_s15, 0  ;;  %p252_p2 = scmp.lt.s32.totalorder %s1480_s12, 3 }
   0xf   : > { %s1483_s17 = smov [#allocation8]   ;;  %s1484_s20 = smov [#allocation7]  }
  0x10   : > { %p1568_p3 = pnand %p982_p0, %p252_p2  ;;  %s296_s18 = sshll.u32 %s1483_s17, 4  ;;  %s1581_s18 = int_to_ptr.vmem [resolvable:$true] %s296_s18 }
  0x11   : > { %s280_s21 = sshll.u32 %s1484_s20, 4  ;;  %s1287_s22 = scalar_lea.vmem %s265_s14, 1024  ;;  %s1583_s21 = int_to_ptr.vmem [resolvable:$true] %s280_s21 }
  0x12   : > { %s1843_s16 = scalar_select %p1568_p3, 1, 0 }
  0x13   : > { %p1173_p5 = pneg %p1568_p3  ;;  %p1288_p8 = scmp.ne.s32.totalorder %s265_s14, %s1287_s22 }
  0x14   : > { %p1295_p11 = scmp.lt.s32.totalorder %s265_s14, %s265_s14  ;;  %p1296_p12 = scmp.lt.s32.totalorder %s1287_s22, %s1287_s22 }
  0x15   : > { %p1577_p6 = pnand %p1173_p5, %p1835_p1 }
  0x16   : > { %p1297_p13 = por %p1296_p12, %p1295_p11 }
  0x17   : > { %p1278_p7 = pneg %p1577_p6 }
  0x19   : > { %p1290_p9 = pnand %p1288_p8, %p1278_p7 }
  0x1b   : > { %p1291_p10 = pneg %p1290_p9 }
  0x1d   : > { %p1298_p0 = pnand %p1297_p13, %p1291_p10 }
  0x1f   : > { %1301 = shalt.err (!%p1298_p0)
}
  0x20   : > { %s1485_s23 = smov 64   ;;  %s1486_s24 = smov 4  }
  0x21   : > { %s1845_s1 = sld [smem:[#allocation16_spill]]  ;;  %s1313_s27 = scalar_lea.vmem %s1581_s18, 1024 }
  0x22   : > { %p1314_p2 = scmp.ne.s32.totalorder %s1581_s18, %s1313_s27  ;;  %p1321_p9 = scmp.lt.s32.totalorder %s1581_s18, %s1581_s18 }
  0x23   : > { %p1322_p10 = scmp.lt.s32.totalorder %s1313_s27, %s1313_s27 }
  0x24   : > { %p1316_p5 = pnand %p1314_p2, %p1278_p7 }
  0x25   : > { %p1323_p11 = por %p1322_p10, %p1321_p9 }
  0x26   : > { %p1317_p8 = pneg %p1316_p5 }
  0x27   : > { %1176 = dma.hbm_to_vmem [thread:$0]  (!%p1577_p6), %s1845_s1, 1024, %s265_s14, [#allocation6], %s1485_s23, %s1485_s23, %s1486_s24  }
  0x28   : > { %p1324_p12 = pnand %p1323_p11, %p1317_p8 }
  0x2a   : > { %1327 = shalt.err (!%p1324_p12)
}
  0x2b   : > { %s1846_s5 = sld [smem:[#allocation18_spill]]  ;;  %s1339_s13 = scalar_lea.vmem %s1583_s21, 1024 }
  0x2c   : > { %p1340_p13 = scmp.ne.s32.totalorder %s1583_s21, %s1339_s13  ;;  %p1347_p5 = scmp.lt.s32.totalorder %s1583_s21, %s1583_s21 }
  0x2d   : > { %p1348_p8 = scmp.lt.s32.totalorder %s1339_s13, %s1339_s13 }
  0x2e   : > { %p1342_p0 = pnand %p1340_p13, %p1278_p7 }
  0x2f   : > { %p1349_p9 = por %p1348_p8, %p1347_p5 }
  0x30   : > { %p1343_p2 = pneg %p1342_p0 }
  0x31   : > { %1182 = dma.hbm_to_vmem [thread:$0]  (!%p1577_p6), %s1846_s5, 1024, %s1581_s18, [#allocation9], %s1485_s23, %s1485_s23, %s1486_s24  }
  0x32   : > { %p1350_p10 = pnand %p1349_p9, %p1343_p2 }
  0x34   : > { %1353 = shalt.err (!%p1350_p10)
}
  0x35   : > { %s1847_s3 = sld [smem:[#allocation17_spill]]  ;;  %s1487_s18 = smov [#allocation10]  }
  0x36   : > { %s312_s20 = sshll.u32 %s1487_s18, 4  ;;  %s313_s20 = int_to_ptr.vmem [resolvable:$true] %s312_s20 }
  0x37   : > { %s1365_s22 = scalar_lea.vmem %s313_s20, 1024  ;;  %p1373_p0 = scmp.lt.s32.totalorder %s313_s20, %s313_s20 }
  0x38   : > { %p1366_p11 = scmp.ne.s32.totalorder %s313_s20, %s1365_s22  ;;  %p1374_p2 = scmp.lt.s32.totalorder %s1365_s22, %s1365_s22 }
  0x3a   : > { %p1368_p12 = pnand %p1366_p11, %p1278_p7  ;;  %p1375_p5 = por %p1374_p2, %p1373_p0 }
  0x3b   : > { %1179 = dma.hbm_to_vmem [thread:$0]  (!%p1577_p6), %s1847_s3, 1024, %s1583_s21, [#allocation6], %s1485_s23, %s1485_s23, %s1486_s24  }
  0x3c   : > { %p1369_p13 = pneg %p1368_p12 }
  0x3e   : > { %p1376_p8 = pnand %p1375_p5, %p1369_p13 }
  0x40   : > { %1379 = shalt.err (!%p1376_p8)
}
  0x41   : > { %s1848_s7 = sld [smem:[#allocation19_spill]]  ;;  %s981_s19 = sadd.s32 4294967294, %s1480_s12  }
  0x42   : > { %s1643_s26 = sadd.s32 1, %s1480_s12   ;;  %s34_s28 = sadd.s32 1, %s1476_s11 }
  0x43   : > { %s31_s27 = ssub.s32 %s1480_s12, %s1643_s26  ;;  %p41_p9 = scmp.ne.s32.totalorder %s1476_s11, %s1472_s10 }
  0x44   : > { %p32_p7 = scmp.eq.s32.totalorder %s31_s27, 0  ;;  %p42_p10 = scmp.eq.s32.totalorder %s1480_s12, 0 }
  0x45   : > { %p47_p11 = scmp.ne.s32.totalorder %s1472_s10, %s1468_s30  ;;  %p239_p13 = scmp.eq.s32.totalorder %s1563_s15, 1 }
  0x46   : > { %s1654_s29 = scalar_select %p32_p7, %s1476_s11, %s34_s28  }
  0x47   : > { %1185 = dma.hbm_to_vmem [thread:$0]  (!%p1577_p6), %s1848_s7, 1024, %s313_s20, [#allocation9], %s1485_s23, %s1485_s23, %s1486_s24  }
  0x48   : > { %p1656_p12 = por %p42_p10, %p41_p9  ;;  %p1662_p6 = por %p1835_p1, %p47_p11 }
  0x49   : > { %p245_p0 = scmp.eq.s32.totalorder %s981_s19, 1  ;;  %p1198_p2 = scmp.lt.s32.totalorder %s1480_s12, 2 }
  0x4a   : > { %s1850_s23 = scalar_select %p1662_p6, 1, 0 }
  0x4b   : > { %s329_s24 = sand.u32 1, %s1476_s11   ;;  %p1669_p5 = por %p239_p13, %p41_p9 }
  0x4c   : > { %p1673_p8 = por %p245_p0, %p47_p11  ;;  %s988_s18 = sshll.u32 %s329_s24, 2 }
  0x4d   : > { %s1851_s14 = scalar_select %p1669_p5, 1, 0 }
  0x4e   : > { %s1852_s17 = scalar_select %p1673_p8, 1, 0 }
  0x4f   : > { %s989_s20 = sshll.u32 %s1480_s12, 6  ;;  %s333_s19 = scalar_lea.vmem [#allocation2], %s988_s18 }
  0x50   : > { %s1681_s25 = scalar_lea.hbm %s1825_s0, %s989_s20  ;;  %s340_s27 = sshll.u32 %s333_s19, 4  ;;  %s341_s27 = int_to_ptr.vmem [resolvable:$true] %s340_s27 }
  0x51   : > { %p1685_p7 = pnand %p1198_p2, %p1656_p12  ;;  %s330_s1 = scalar_lea.sflag [#allocation3], %s329_s24 }
  0x52   : > { %s1380_s3 = scalar_lea.hbm %s1681_s25, 64  ;;  %s1385_s21 = scalar_lea.hbm %s1825_s0, 128 }
  0x53   : > { %p1381_p9 = scmp.ne.s32.totalorder %s1681_s25, %s1380_s3  ;;  %p1382_p10 = pneg %p1685_p7 }
  0x54   : > { %p1386_p0 = scmp.lt.s32.totalorder %s1681_s25, %s1825_s0  ;;  %p1387_p12 = scmp.lt.s32.totalorder %s1385_s21, %s1380_s3 }
  0x55   : > { %p1383_p11 = pnand %p1382_p10, %p1381_p9 }
  0x56   : > { %p1388_p2 = por %p1387_p12, %p1386_p0 }
  0x57   : > { %p1384_p13 = pneg %p1383_p11 }
  0x59   : > { %p1389_p4 = pnand %p1388_p2, %p1384_p13 }
  0x5b   : > { %1392 = shalt.err (!%p1389_p4)
}
  0x5c   : > { %s1393_s13 = scalar_lea.vmem %s341_s27, 64  ;;  %s1488_s24 = smov [#allocation2]  }
  0x5d   : > { %p1394_p1 = scmp.ne.s32.totalorder %s341_s27, %s1393_s13  ;;  %s1398_s5 = sshll.u32 %s1488_s24, 4  ;;  %s1399_s5 = int_to_ptr.vmem [resolvable:$false] %s1398_s5 }
  0x5e   : > { %s1400_s7 = scalar_lea.vmem %s1399_s5, 128  ;;  %p1401_p9 = scmp.lt.s32.totalorder %s341_s27, %s1399_s5 }
  0x5f   : > { %p1396_p8 = pnand %p1394_p1, %p1382_p10  ;;  %p1402_p11 = scmp.lt.s32.totalorder %s1400_s7, %s1393_s13 }
  0x61   : > { %p1397_p5 = pneg %p1396_p8  ;;  %p1403_p6 = por %p1402_p11, %p1401_p9 }
  0x63   : > { %p1404_p3 = pnand %p1403_p6, %p1397_p5 }
  0x65   : > { %1407 = shalt.err (!%p1404_p3)
}
  0x66   : > { %1189 = dma.hbm_to_vmem [thread:$0]  (!%p1685_p7), %s1681_s25, 64, %s341_s27, %s330_s1  }
  0x67   : > { %p1854_p13 = scmp.ne.s32.totalorder %s1843_s16, 0 }
  0x68   : > { %s1706_s3 = sand.u32 (!%p1854_p13), 1, %s1472_s10   ;;  %p1855_p1 = scmp.ne.s32.totalorder (!%p1854_p13), %s1850_s23, 0 }
  0x69   : > { %349 = sbr.rel (%p1854_p13) target bundleno = 957 (0x3bd), region = 56  ;;  %s991_s20 = sshll.u32 (!%p1854_p13), %s1706_s3, 2 }
  0x6a   : > { %s352_s22 = scalar_lea.sflag (!%p1854_p13), [#allocation3], %s1706_s3  ;;  %s1710_s5 = scalar_lea.vmem (!%p1854_p13), [#allocation2], %s991_s20 }
  0x6e   : > { %1451 = dma.done.wait (%p1855_p1), %s352_s22, 64  }
  0x6f   : > { %1453 = vsyncadd (%p1855_p1), %s352_s22, 4294967232  ;;  %p1856_p3 = scmp.eq.s32.totalorder %s1563_s15, 0 }
  0x71   : > { %1455 = dma.done.wait (%p1856_p3), [#allocation6], 2048   ;;  %p1857_p4 = pmov %p1856_p3 }
  0x72   : > { %p1858_p6 = pmov %p1856_p3 }
  0x73   : > { %1457 = vsyncadd (%p1857_p4), [#allocation6], 4294965248 }
  0x74   : > { %1459 = dma.done.wait (%p1858_p6), [#allocation9], 2048   ;;  %p1859_p5 = pmov %p1856_p3 }
  0x75   : > { %v1489_v0 = vmov 0.0   ;;  %vm1490_vm0 = vmmov 0   ;;  %v1244_v1 = vld [vmem:[#allocation5 + $0x38] sm:$0xff]   ;;  %v1245_v2 = vld [vmem:[#allocation5 + $0x30] sm:$0xff]   ;;  %v1246_v3 = vld [vmem:[#allocation5 + $0x28] sm:$0xff]   ;;  %s996_s28 = sshll.u32 %s1706_s3, 3 }
  0x76   : > { %1461 = vsyncadd (%p1859_p5), [#allocation9], 4294965248  ;;  %1073 = vmatprep.subr.bf16.mxu0 %v1489_v0  ;;  %1089 = vmatprep.mubr.msk.bf16.mxu0 %vm1490_vm0, %v1489_v0  ;;  %v1252_v4 = vld [vmem:[#allocation7 + $0x38] sm:$0xff]   ;;  %v1247_v5 = vld [vmem:[#allocation5 + $0x20] sm:$0xff]   ;;  %s1034_s19 = sshll.u32 %s1563_s15, 7  ;;  %s405_s13 = scalar_lea.vmem [#allocation11], %s996_s28 }
  0x77   : > { %1093 = vmatprep.subr.bf16.mxu1 %v1489_v0  ;;  %1109 = vmatprep.mubr.msk.bf16.mxu1 %vm1490_vm0, %v1489_v0  ;;  %v1253_v6 = vld [vmem:[#allocation7 + $0x30] sm:$0xff]   ;;  %v1248_v7 = vld [vmem:[#allocation5 + $0x18] sm:$0xff]   ;;  %v1254_v8 = vld [vmem:[#allocation7 + $0x28] sm:$0xff]   ;;  %s873_s24 = sshll.u32 %s405_s13, 4  ;;  %s860_s1 = scalar_lea.sflag [#allocation4], %s1706_s3  ;;  %s1784_s24 = int_to_ptr.vmem [resolvable:$true] %s873_s24 }
  0x78   : > { %1074 = vmatpush3.bf16.msra.mxu0 %v1244_v1  ;;  %1094 = vmatpush3.bf16.msra.mxu1 %v1252_v4  ;;  %v1249_v9 = vld [vmem:[#allocation5 + $0x10] sm:$0xff]   ;;  %v1255_v10 = vld [vmem:[#allocation7 + $0x20] sm:$0xff]   ;;  %v1250_v11 = vld [vmem:[#allocation5 + $0x8] sm:$0xff]   ;;  %s1408_s7 = scalar_lea.vmem %s1784_s24, 128  ;;  %p1860_p7 = scmp.ne.s32.totalorder %s1851_s14, 0 }
  0x79   : > { %1075 = vmatprep.subr.bf16.mxu0 %v1489_v0  ;;  %1095 = vmatprep.subr.bf16.mxu1 %v1489_v0  ;;  %v1256_v12 = vld [vmem:[#allocation7 + $0x18] sm:$0xff]   ;;  %v1251_v13 = vld [vmem:[#allocation5] sm:$0xff]   ;;  %v1257_v14 = vld [vmem:[#allocation7 + $0x10] sm:$0xff]   ;;  %p1409_p8 = scmp.ne.s32.totalorder %s1784_s24, %s1408_s7  ;;  %s1491_s15 = smov [#allocation11]  }
  0x7a   : > { %v407_v15 = vld [vmem:[%s1710_s5] sm:$0xf]  ;;  %v1258_v16 = vld [vmem:[#allocation7 + $0x8] sm:$0xff]   ;;  %v1259_v17 = vld [vmem:[#allocation7] sm:$0xff]   ;;  %s1782_s5 = scalar_lea.hbm %s1834_s9, %s1034_s19  ;;  %s1412_s16 = sshll.u32 %s1491_s15, 4  ;;  %s1413_s16 = int_to_ptr.vmem [resolvable:$false] %s1412_s16 }
  0x7b   : > { %v1260_v18 = vld [vmem:[#allocation8 + $0x38] sm:$0xff]   ;;  %v1261_v19 = vld [vmem:[#allocation8 + $0x30] sm:$0xff]   ;;  %v1262_v20 = vld [vmem:[#allocation8 + $0x28] sm:$0xff]   ;;  %p1410_p10 = pnand %p1409_p8, %p1860_p7  ;;  %s1414_s23 = scalar_lea.vmem %s1413_s16, 256 }
  0x7c   : > { %1076 = vmatpush3.bf16.msra.mxu0 %v1245_v2  ;;  %1096 = vmatpush3.bf16.msra.mxu1 %v1253_v6  ;;  %v1263_v21 = vld [vmem:[#allocation8 + $0x20] sm:$0xff]   ;;  %v1264_v22 = vld [vmem:[#allocation8 + $0x18] sm:$0xff]   ;;  %v1265_v23 = vld [vmem:[#allocation8 + $0x10] sm:$0xff]   ;;  %p1415_p12 = scmp.lt.s32.totalorder %s1784_s24, %s1413_s16  ;;  %p1416_p2 = scmp.lt.s32.totalorder %s1414_s23, %s1408_s7 }
  0x7d   : > { %1077 = vmatprep.subr.bf16.mxu0 %v1489_v0  ;;  %1097 = vmatprep.subr.bf16.mxu1 %v1489_v0  ;;  %v997_v24 = vld [vmem:[%s1827_s2] ss:$0 sm:$0xff]  ;;  %v1266_v32 = vld [vmem:[#allocation8 + $0x8] sm:$0xff]   ;;  %v1267_v33 = vld [vmem:[#allocation8] sm:$0xff]   ;;  %p1411_p0 = pneg %p1410_p10 }
  0x7e   : > { %v1268_v34 = vld [vmem:[#allocation10 + $0x38] sm:$0xff]   ;;  %v1269_v35 = vld [vmem:[#allocation10 + $0x30] sm:$0xff]   ;;  %v1270_v36 = vld [vmem:[#allocation10 + $0x28] sm:$0xff]   ;;  %p1417_p9 = por %p1416_p2, %p1415_p12 }
  0x7f   : > { %v1271_v37 = vld [vmem:[#allocation10 + $0x20] sm:$0xff]   ;;  %v1272_v38 = vld [vmem:[#allocation10 + $0x18] sm:$0xff]   ;;  %v1273_v39 = vld [vmem:[#allocation10 + $0x10] sm:$0xff]  }
  0x80   : > { %1078 = vmatpush3.bf16.msra.mxu0 %v1246_v3  ;;  %1098 = vmatpush3.bf16.msra.mxu1 %v1254_v8  ;;  %v1006_v40 = vld [vmem:[%s1829_s4] ss:$0 sm:$0xff]  ;;  %v1274_v48 = vld [vmem:[#allocation10 + $0x8] sm:$0xff]   ;;  %v1275_v49 = vld [vmem:[#allocation10] sm:$0xff]   ;;  %p1418_p11 = pnand %p1417_p9, %p1411_p0 }
  0x81   : > { %1079 = vmatprep.subr.bf16.mxu0 %v1489_v0  ;;  %1099 = vmatprep.subr.bf16.mxu1 %v1489_v0  ;;  %v1015_v50 = vld [vmem:[%s1831_s6] ss:$0 sm:$0xff] }
  0x82   : > { %v1024_v58 = vld [vmem:[%s1833_s8] ss:$0 sm:$0xff] }
  0x84   : > { %1080 = vmatpush3.bf16.msra.mxu0 %v1247_v5  ;;  %1100 = vmatpush3.bf16.msra.mxu1 %v1255_v10 }
  0x85   : > { %1081 = vmatprep.subr.bf16.mxu0 %v1489_v0  ;;  %1101 = vmatprep.subr.bf16.mxu1 %v1489_v0 }
  0x88   : > { %1082 = vmatpush3.bf16.msra.mxu0 %v1248_v7  ;;  %1102 = vmatpush3.bf16.msra.mxu1 %v1256_v12 }
  0x89   : > { %1083 = vmatprep.subr.bf16.mxu0 %v1489_v0  ;;  %1103 = vmatprep.subr.bf16.mxu1 %v1489_v0 }
  0x8c   : > { %1084 = vmatpush3.bf16.msra.mxu0 %v1249_v9  ;;  %1104 = vmatpush3.bf16.msra.mxu1 %v1257_v14 }
  0x8d   : > { %1085 = vmatprep.subr.bf16.mxu0 %v1489_v0  ;;  %1105 = vmatprep.subr.bf16.mxu1 %v1489_v0 }
  0x90   : > { %1086 = vmatpush3.bf16.msra.mxu0 %v1250_v11  ;;  %1106 = vmatpush3.bf16.msra.mxu1 %v1258_v16 }
  0x91   : > { %1087 = vmatprep.subr.bf16.mxu0 %v1489_v0  ;;  %1107 = vmatprep.subr.bf16.mxu1 %v1489_v0 }
  0x94   : > { %1088 = vmatpush3.bf16.msra.mxu0 %v1251_v13  ;;  %1108 = vmatpush3.bf16.msra.mxu1 %v1259_v17 }
  0x95   : > { %1113 = vmatprep.subr.bf16.mxu0 %v1489_v0  ;;  %1133 = vmatprep.subr.bf16.mxu1 %v1489_v0 }
  0x97   : > { %1090 = vmatmul.mubr.bf16.vlgmr.msra.gmra.mxu0 %v407_v15 }
  0x98   : > { %1129 = vmatprep.mubr.msk.bf16.mxu0 %vm1490_vm0, %v1489_v0  ;;  %1114 = vmatpush3.bf16.msra.mxu0 %v1260_v18 }
  0x99   : > { %1115 = vmatprep.subr.bf16.mxu0 %v1489_v0 }
  0x9c   : > { %1116 = vmatpush3.bf16.msra.mxu0 %v1261_v19 }
  0x9d   : > { %1117 = vmatprep.subr.bf16.mxu0 %v1489_v0 }
  0xa0   : > { %1118 = vmatpush3.bf16.msra.mxu0 %v1262_v20 }
  0xa1   : > { %1119 = vmatprep.subr.bf16.mxu0 %v1489_v0 }
  0xa4   : > { %1120 = vmatpush3.bf16.msra.mxu0 %v1263_v21 }
  0xa5   : > { %1121 = vmatprep.subr.bf16.mxu0 %v1489_v0 }
  0xa8   : > { %1122 = vmatpush3.bf16.msra.mxu0 %v1264_v22 }
  0xa9   : > { %1123 = vmatprep.subr.bf16.mxu0 %v1489_v0 }
  0xac   : > { %1124 = vmatpush3.bf16.msra.mxu0 %v1265_v23 }
  0xad   : > { %1125 = vmatprep.subr.bf16.mxu0 %v1489_v0 }
  0xb0   : > { %1126 = vmatpush3.bf16.msra.mxu0 %v1266_v32 }
  0xb1   : > { %1127 = vmatprep.subr.bf16.mxu0 %v1489_v0 }
  0xb4   : > { %1128 = vmatpush3.bf16.msra.mxu0 %v1267_v33 }
 0x157   : > { %v513_v25 = vpop.f32.mrf.mxu0 }
 0x158   : > { %v514_v26 = vadd.f32 %v997_v24, %v513_v25 }
 0x159   : > { %v1091_v27 = vpop.f32.mrf.mxu0 }
 0x15a   : > { %v519_v28 = vmax.f32 %v514_v26, 0.0 }
 0x15b   : > { %v516_v29 = vpop.f32.mrf.mxu0 }
 0x15c   : > { %v520_v30 = vpack.c.bf16 %v519_v28, %v519_v28 }
 0x15d   : > { %v1092_v31 = vpop.f32.mrf.mxu0 }
 0x15e   : > { %1110 = vmatmul.mubr.bf16.vlgmr.msra.gmra.mxu1 %v520_v30 }
 0x15f   : > { %1149 = vmatprep.mubr.msk.bf16.mxu1 %vm1490_vm0, %v1489_v0  ;;  %1134 = vmatpush3.bf16.msra.mxu1 %v1268_v34 }
 0x160   : > { %1135 = vmatprep.subr.bf16.mxu1 %v1489_v0 }
 0x163   : > { %1136 = vmatpush3.bf16.msra.mxu1 %v1269_v35 }
 0x164   : > { %1137 = vmatprep.subr.bf16.mxu1 %v1489_v0 }
 0x167   : > { %1138 = vmatpush3.bf16.msra.mxu1 %v1270_v36 }
 0x168   : > { %1139 = vmatprep.subr.bf16.mxu1 %v1489_v0 }
 0x16b   : > { %1140 = vmatpush3.bf16.msra.mxu1 %v1271_v37 }
 0x16c   : > { %1141 = vmatprep.subr.bf16.mxu1 %v1489_v0 }
 0x16f   : > { %1142 = vmatpush3.bf16.msra.mxu1 %v1272_v38 }
 0x170   : > { %1143 = vmatprep.subr.bf16.mxu1 %v1489_v0 }
 0x173   : > { %1144 = vmatpush3.bf16.msra.mxu1 %v1273_v39 }
 0x174   : > { %1145 = vmatprep.subr.bf16.mxu1 %v1489_v0 }
 0x177   : > { %1146 = vmatpush3.bf16.msra.mxu1 %v1274_v48 }
 0x178   : > { %1147 = vmatprep.subr.bf16.mxu1 %v1489_v0 }
 0x17b   : > { %1148 = vmatpush3.bf16.msra.mxu1 %v1275_v49 }
 0x21e   : > { %v626_v41 = vpop.f32.mrf.mxu1 }
 0x21f   : > { %v627_v42 = vadd.f32 %v1006_v40, %v626_v41 }
 0x220   : > { %v1111_v43 = vpop.f32.mrf.mxu1 }
 0x221   : > { %v632_v44 = vmax.f32 %v627_v42, 0.0 }
 0x222   : > { %v629_v45 = vpop.f32.mrf.mxu1 }
 0x223   : > { %v633_v46 = vpack.c.bf16 %v632_v44, %v632_v44 }
 0x224   : > { %v1112_v47 = vpop.f32.mrf.mxu1 }
 0x225   : > { %1130 = vmatmul.mubr.bf16.vlgmr.msra.gmra.mxu0 %v633_v46 }
 0x2e5   : > { %v739_v51 = vpop.f32.mrf.mxu0 }
 0x2e6   : > { %v740_v52 = vadd.f32 %v1015_v50, %v739_v51 }
 0x2e7   : > { %v1131_v53 = vpop.f32.mrf.mxu0 }
 0x2e8   : > { %v745_v54 = vmax.f32 %v740_v52, 0.0 }
 0x2e9   : > { %v742_v55 = vpop.f32.mrf.mxu0 }
 0x2ea   : > { %v746_v56 = vpack.c.bf16 %v745_v54, %v745_v54 }
 0x2eb   : > { %v1132_v57 = vpop.f32.mrf.mxu0 }
 0x2ec   : > { %1150 = vmatmul.mubr.bf16.vlgmr.msra.gmra.mxu1 %v746_v56 }
 0x3ac   : > { %v852_v59 = vpop.f32.mrf.mxu1 }
 0x3ad   : > { %v853_v60 = vadd.f32 %v1024_v58, %v852_v59 }
 0x3ae   : > { %v1151_v61 = vpop.f32.mrf.mxu1 }
 0x3af   : > { %858 = vst [vmem:[%s405_s13] sm:$0xff] %v853_v60 }
 0x3b0   : > { %v855_v62 = vpop.f32.mrf.mxu1 }
 0x3b1   : > { %1421 = shalt.err (!%p1418_p11)
}
 0x3b2   : > { %s1422_s25 = scalar_lea.hbm %s1782_s5, 128  ;;  %s1426_s28 = scalar_lea.hbm %s1834_s9, 256 }
 0x3b3   : > { %p1423_p13 = scmp.ne.s32.totalorder %s1782_s5, %s1422_s25  ;;  %p1427_p4 = scmp.lt.s32.totalorder %s1782_s5, %s1834_s9 }
 0x3b4   : > { %p1428_p6 = scmp.lt.s32.totalorder %s1426_s28, %s1422_s25 }
 0x3b5   : > { %p1424_p1 = pnand %p1423_p13, %p1860_p7 }
 0x3b6   : > { %p1429_p5 = por %p1428_p6, %p1427_p4 }
 0x3b7   : > { %p1425_p3 = pneg %p1424_p1 }
 0x3b9   : > { %p1430_p8 = pnand %p1429_p5, %p1425_p3 }
 0x3bb   : > { %1433 = shalt.err (!%p1430_p8)
}
 0x3bc   : > { %1171 = dma.vmem_to_hbm [thread:$0]  (%p1860_p7), %s1784_s24, 128, %s1782_s5, %s860_s1   ;;  %v1152_v63 = vpop.f32.mrf.mxu1 }
 0x3bd PF: > { %s885_s19 = sand.u32 1, %s1468_s30   ;;  %p1861_p10 = scmp.ne.s32.totalorder %s1852_s17, 0 }
 0x3be   : > { %p1862_p0 = scmp.ge.s32.totalorder %s1480_s12, 2  ;;  %s886_s13 = scalar_lea.sflag [#allocation4], %s885_s19 }
 0x3c0   : > { %p1191_p12 = pnand %p1862_p0, %p1861_p10 }
 0x3c2   : > { %p1192_p2 = pneg %p1191_p12 }
 0x3c4   : > { %1463 = dma.done.wait (%p1192_p2), %s886_s13, 128  }
 0x3c5   : > { %1465 = vsyncadd (%p1192_p2), %s886_s13, 4294967168  ;;  %p24_p9 = scmp.ge.s32.totalorder %s1643_s26, 4   ;;  %s1863_s30 = smov %s1472_s10 }
 0x3c6   : > { %s1864_s10 = smov %s1476_s11  ;;  %s1865_s11 = smov %s1654_s29 }
 0x3c7   : > { %s1866_s12 = smov %s1643_s26  ;;  %26 = sbr.rel (!%p24_p9) target bundleno = 12 (0xc), region = 117 }
 0x3cc   :  { %891 = vsyncpa [#allocation3], 1 }
 0x3cd   :  { %893 = vsyncpa [#allocation3 + $0x1], 1 }
 0x3ce   :  { %894 = vsyncpa [#allocation6], 1 }
 0x3cf   :  { %895 = vsyncpa [#allocation9], 1 }
 0x3d0   :  { %896 = vsyncpa [#allocation4], 1 }
 0x3d1   :  { %898 = vsyncpa [#allocation4 + $0x1], 1 }

</bundles_post_ra>
